<compile_context>
chip_gen: v7x
topology: tpu7x:2x2x1
jax: 0.10.0
libtpu: 0.0.40
codegen_flags: <defaults>
</compile_context>

<pallas_src>
import functools

import jax
import jax.numpy as jnp
from jax import lax
from jax.experimental import pallas as pl
from jax.experimental.pallas import tpu as pltpu


# --------------------------------------------------------------------------- #
# Generation-aware VMEM budgeting (64 MiB physical on v7x, 128 MiB on v5e/v6e).
# --------------------------------------------------------------------------- #
def _vmem_capacity_bytes():
    try:
        cap = int(pltpu.get_tpu_info().vmem_capacity_bytes)
        if cap > 0:
            return cap
    except Exception:
        pass
    return 64 * 1024 * 1024  # conservative default (v7x)


def _pick_hw_tile(hw, c, itemsize, budget):
    """Pick an HW tile (multiple of 128) for the two-pass fallback.

    Per lane-column footprint ~= double-buffered in + out blocks (x dtype) plus ~3
    slab-sized f32 temporaries.  Prefers power-of-two tiles; prefers a divisor of HW
    (>= 512) over padding when the power-of-two tile would not divide HW.
    """
    per_col = max(c * (4 * itemsize + 12), 1)
    max_t = max(128, budget // per_col)
    cap = max(128, ((hw + 127) // 128) * 128)   # never exceed HW rounded up to 128
    t = 128
    while t * 2 <= max_t and t * 2 <= cap:
        t *= 2
    t = min(t, cap)
    if hw % t != 0:
        d = min(t, cap)
        while d >= 512:
            if hw % d == 0:
                return d
            d -= 128
    return t


# --------------------------------------------------------------------------- #
# Fused single-pass kernel: stats + affine apply, one read + one write of x.
# --------------------------------------------------------------------------- #
def _iln_fused_kernel(x_ref, rho_ref, gamma_ref, beta_ref, o_ref, *,
                      eps, hw_total, c_total):
    x = x_ref[...].astype(jnp.float32)                       # (1, C, HW)
    n = jnp.float32(hw_total)
    n_m1 = jnp.float32(max(hw_total - 1, 1))                 # guard HW == 1 (bottleneck)

    # Instance-norm stats (per channel), centered -> numerically stable.
    mean_c = jnp.sum(x, axis=2, keepdims=True) / n           # (1, C, 1)
    d = x - mean_c
    m2_c = jnp.sum(d * d, axis=2, keepdims=True)             # (1, C, 1)
    in_var = m2_c / n_m1
    inv_in = lax.rsqrt(in_var + eps)

    # Layer-norm stats from per-channel (mean, M2) via law of total variance (exact).
    ln_mean = jnp.mean(mean_c, axis=1, keepdims=True)        # (1, 1, 1)
    dc = mean_c - ln_mean
    m2_ln = (jnp.sum(m2_c, axis=1, keepdims=True)
             + n * jnp.sum(dc * dc, axis=1, keepdims=True))
    ln_var = m2_ln / jnp.float32(max(hw_total * c_total - 1, 1))
    inv_ln = lax.rsqrt(ln_var + eps)

    rho = rho_ref[...]
    gamma = gamma_ref[...]
    beta = beta_ref[...]
    a = gamma * (rho * inv_in + (1.0 - rho) * inv_ln)
    b = beta - gamma * (rho * mean_c * inv_in + (1.0 - rho) * ln_mean * inv_ln)

    o_ref[...] = (x * a + b).astype(o_ref.dtype)


# --------------------------------------------------------------------------- #
# Two-pass fallback: tiled stats (pass 1) + fused affine apply (pass 2).
# --------------------------------------------------------------------------- #
def _iln_stats_kernel(x_ref, rho_ref, gamma_ref, beta_ref, a_ref, b_ref,
                      shift_sc, sum_sc, sumsq_sc, *,
                      eps, hw_total, c_total, tile, needs_mask):
    t = pl.program_id(1)
    x = x_ref[...].astype(jnp.float32)                       # (1, C, T)

    if needs_mask:
        pos = t * tile + lax.broadcasted_iota(jnp.int32, x.shape, 2)
        valid = pos < hw_total
        xv = jnp.where(valid, x, 0.0)
    else:
        xv = x

    @pl.when(t == 0)
    def _():
        # Per-channel shift = mean of the first tile: a stable pivot so the later
        # (ss - s^2/n) never cancels catastrophically at large HW.
        cnt0 = jnp.float32(min(tile, hw_total))
        shift_sc[...] = jnp.sum(xv, axis=2, keepdims=True) / cnt0
        sum_sc[...] = jnp.zeros_like(sum_sc)
        sumsq_sc[...] = jnp.zeros_like(sumsq_sc)

    xs = x - shift_sc[...]
    if needs_mask:
        xs = jnp.where(valid, xs, 0.0)
    sum_sc[...] += jnp.sum(xs, axis=2, keepdims=True)        # (1, C, 1)
    sumsq_sc[...] += jnp.sum(xs * xs, axis=2, keepdims=True)

    @pl.when(t == pl.num_programs(1) - 1)
    def _():
        n = jnp.float32(hw_total)
        n_m1 = jnp.float32(max(hw_total - 1, 1))

        s = sum_sc[...]
        ss = sumsq_sc[...]
        shift = shift_sc[...]

        mean_c = shift + s / n                               # (1, C, 1)
        m2_c = jnp.maximum(ss - s * s / n, 0.0)              # shifted -> stable
        in_var = m2_c / n_m1
        inv_in = lax.rsqrt(in_var + eps)

        # Layer-norm stats: combine per-channel (mean, M2) exactly.
        ln_mean = jnp.mean(mean_c, axis=1, keepdims=True)    # (1, 1, 1)
        dc = mean_c - ln_mean
        m2_ln = (jnp.sum(m2_c, axis=1, keepdims=True)
                 + n * jnp.sum(dc * dc, axis=1, keepdims=True))
        ln_var = m2_ln / jnp.float32(max(hw_total * c_total - 1, 1))
        inv_ln = lax.rsqrt(ln_var + eps)

        rho = rho_ref[...]
        gamma = gamma_ref[...]
        beta = beta_ref[...]
        a = gamma * (rho * inv_in + (1.0 - rho) * inv_ln)
        b = beta - gamma * (rho * mean_c * inv_in + (1.0 - rho) * ln_mean * inv_ln)
        a_ref[...] = a
        b_ref[...] = b


def _iln_apply_kernel(a_ref, b_ref, x_ref, o_ref):
    """Single fused FMA per element: out = x * A + B (A, B per channel)."""
    x = x_ref[...].astype(jnp.float32)                       # (1, C, T)
    o_ref[...] = (x * a_ref[...] + b_ref[...]).astype(o_ref.dtype)


# --------------------------------------------------------------------------- #
# Wrapper.
# --------------------------------------------------------------------------- #
def iln_forward(x, rho, gamma, beta, eps=1e-5, max_fused_bytes=None):
    """x: (B, C, H, W) NCHW.  rho/gamma/beta: (1, C, 1, 1) as in the torch ILN module.

    Output dtype matches x (bf16 in/out is supported; accumulation stays f32).
    """
    B, C, H, W = x.shape
    HW = H * W
    in_item = jnp.dtype(x.dtype).itemsize

    x_flat = x.reshape(B, C, HW)
    rho3 = rho.reshape(1, C, 1).astype(jnp.float32)
    gamma3 = gamma.reshape(1, C, 1).astype(jnp.float32)
    beta3 = beta.reshape(1, C, 1).astype(jnp.float32)

    cap = _vmem_capacity_bytes()
    budget = cap // 2                     # working-set budget for block sizing
    vmem_limit = (cap * 3) // 4           # scoped VMEM limit handed to Mosaic
    if max_fused_bytes is None:
        max_fused_bytes = budget

    # Per-element footprint of the fused path: double-buffered in + out blocks (x dtype)
    # plus ~3 slab-sized f32 temporaries inside the body.
    fused_bytes = C * HW * (4 * in_item + 12)

    if fused_bytes <= max_fused_bytes:
        # ---------------- fused single-pass path ----------------
        out_flat = pl.pallas_call(
            functools.partial(_iln_fused_kernel, eps=float(eps), hw_total=HW, c_total=C),
            out_shape=jax.ShapeDtypeStruct((B, C, HW), x.dtype),
            grid_spec=pltpu.PrefetchScalarGridSpec(
                num_scalar_prefetch=0,
                grid=(B,),
                in_specs=[
                    pl.BlockSpec((1, C, HW), lambda b: (b, 0, 0)),
                    pl.BlockSpec((1, C, 1), lambda b: (0, 0, 0)),
                    pl.BlockSpec((1, C, 1), lambda b: (0, 0, 0)),
                    pl.BlockSpec((1, C, 1), lambda b: (0, 0, 0)),
                ],
                out_specs=pl.BlockSpec((1, C, HW), lambda b: (b, 0, 0)),
            ),
            compiler_params=pltpu.CompilerParams(
                dimension_semantics=("parallel",),
                vmem_limit_bytes=vmem_limit,
            ),
        )(x_flat, rho3, gamma3, beta3)
        return out_flat.reshape(B, C, H, W)

    # ---------------- two-pass fallback (slab too big for VMEM) ----------------
    T = _pick_hw_tile(HW, C, in_item, budget)
    nt = -(-HW // T)
    HW_pad = nt * T
    needs_mask = HW_pad != HW
    x_pad = x_flat if not needs_mask else jnp.pad(
        x_flat, ((0, 0), (0, 0), (0, HW_pad - HW)))

    # Pass 1: per-channel stats -> fused per-channel affine coefficients A, B.
    a_coef, b_coef = pl.pallas_call(
        functools.partial(_iln_stats_kernel, eps=float(eps), hw_total=HW,
                          c_total=C, tile=T, needs_mask=needs_mask),
        out_shape=(
            jax.ShapeDtypeStruct((B, C, 1), jnp.float32),
            jax.ShapeDtypeStruct((B, C, 1), jnp.float32),
        ),
        grid_spec=pltpu.PrefetchScalarGridSpec(
            num_scalar_prefetch=0,
            grid=(B, nt),
            in_specs=[
                pl.BlockSpec((1, C, T), lambda b, t: (b, 0, t)),
                pl.BlockSpec((1, C, 1), lambda b, t: (0, 0, 0)),
                pl.BlockSpec((1, C, 1), lambda b, t: (0, 0, 0)),
                pl.BlockSpec((1, C, 1), lambda b, t: (0, 0, 0)),
            ],
            out_specs=[
                pl.BlockSpec((1, C, 1), lambda b, t: (b, 0, 0)),
                pl.BlockSpec((1, C, 1), lambda b, t: (b, 0, 0)),
            ],
            scratch_shapes=[
                pltpu.VMEM((1, C, 1), jnp.float32),   # shift
                pltpu.VMEM((1, C, 1), jnp.float32),   # shifted sum
                pltpu.VMEM((1, C, 1), jnp.float32),   # shifted sum of squares
            ],
        ),
        compiler_params=pltpu.CompilerParams(
            dimension_semantics=("parallel", "arbitrary"),
            vmem_limit_bytes=vmem_limit,
        ),
    )(x_pad, rho3, gamma3, beta3)

    # Pass 2: lane-dense fused apply, both grid axes parallel (megacore-friendly).
    out_flat = pl.pallas_call(
        _iln_apply_kernel,
        out_shape=jax.ShapeDtypeStruct((B, C, HW_pad), x.dtype),
        grid_spec=pltpu.PrefetchScalarGridSpec(
            num_scalar_prefetch=0,
            grid=(B, nt),
            in_specs=[
                pl.BlockSpec((1, C, 1), lambda b, t: (b, 0, 0)),
                pl.BlockSpec((1, C, 1), lambda b, t: (b, 0, 0)),
                pl.BlockSpec((1, C, T), lambda b, t: (b, 0, t)),
            ],
            out_specs=pl.BlockSpec((1, C, T), lambda b, t: (b, 0, t)),
        ),
        compiler_params=pltpu.CompilerParams(
            dimension_semantics=("parallel", "parallel"),
            vmem_limit_bytes=vmem_limit,
        ),
    )(a_coef, b_coef, x_pad)

    if needs_mask:
        out_flat = out_flat[:, :, :HW]
    return out_flat.reshape(B, C, H, W)


# --------------------------------------------------------------------------- #
# Self-test.
# --------------------------------------------------------------------------- #
if __name__ == "__main__":
    key = jax.random.PRNGKey(0)
    kx, kg, kb, kx2 = jax.random.split(key, 4)

    def reference(x, rho, gamma, beta, eps=1e-5):
        B, C, H, W = x.shape
        in_mean = jnp.mean(x, axis=(2, 3), keepdims=True)
        in_var = jnp.sum((x - in_mean) ** 2, axis=(2, 3), keepdims=True) / max(H * W - 1, 1)
        out_in = (x - in_mean) / jnp.sqrt(in_var + eps)
        ln_mean = jnp.mean(x, axis=(1, 2, 3), keepdims=True)
        ln_var = jnp.sum((x - ln_mean) ** 2, axis=(1, 2, 3), keepdims=True) / max(C * H * W - 1, 1)
        out_ln = (x - ln_mean) / jnp.sqrt(ln_var + eps)
        return (rho * out_in + (1.0 - rho) * out_ln) * gamma + beta

    # Case 1: small UnetGenerator-like activation -> fused single-pass path.
    B, C, H, W = 2, 4, 16, 16
    x = jax.random.normal(kx, (B, C, H, W), dtype=jnp.float32) + 0.5  # non-zero mean
    rho = jnp.full((1, C, 1, 1), 0.25, dtype=jnp.float32)
    gamma = 1.0 + 0.05 * jax.random.normal(kg, (1, C, 1, 1), dtype=jnp.float32)
    beta = 0.05 * jax.random.normal(kb, (1, C, 1, 1), dtype=jnp.float32)

    ref = reference(x, rho, gamma, beta, eps=1e-5)

    out_fused = iln_forward(x, rho, gamma, beta, eps=1e-5)
    jax.block_until_ready(out_fused)
    assert jnp.allclose(out_fused, ref, atol=3e-5, rtol=3e-5), "fused path mismatch"

    # Case 2: force the two-pass (tiled stats + apply) fallback on the same input.
    out_tiled = iln_forward(x, rho, gamma, beta, eps=1e-5, max_fused_bytes=0)
    jax.block_until_ready(out_tiled)
    assert jnp.allclose(out_tiled, ref, atol=3e-5, rtol=3e-5), "two-pass path mismatch"

    # Case 3: non-128-multiple spatial -> exercises cdiv padding + masked stats.
    B2, C2, H2, W2 = 1, 8, 6, 6
    x2 = jax.random.normal(kx2, (B2, C2, H2, W2), dtype=jnp.float32) - 0.3
    rho2 = jnp.full((1, C2, 1, 1), 0.6, dtype=jnp.float32)
    gamma2 = jnp.ones((1, C2, 1, 1), dtype=jnp.float32)
    beta2 = jnp.zeros((1, C2, 1, 1), dtype=jnp.float32)
    out2 = iln_forward(x2, rho2, gamma2, beta2, eps=1e-5, max_fused_bytes=0)
    jax.block_until_ready(out2)
    ref2 = reference(x2, rho2, gamma2, beta2, eps=1e-5)
    assert jnp.allclose(out2, ref2, atol=3e-5, rtol=3e-5), "padded/masked path mismatch"

    print("KERNEL_OK")
</pallas_src>

<mosaic_0001>
module attributes {stable_mosaic.version = 11 : i64} {
  func.func @_iln_fused_kernel(%arg0: i32, %arg1: memref<1x4x256xf32, #tpu.memory_space<vmem>>, %arg2: memref<1x4x1xf32, #tpu.memory_space<vmem>>, %arg3: memref<1x4x1xf32, #tpu.memory_space<vmem>>, %arg4: memref<1x4x1xf32, #tpu.memory_space<vmem>>, %arg5: memref<1x4x256xf32, #tpu.memory_space<vmem>>) attributes {dimension_semantics = [#tpu.dimension_semantics<parallel>], iteration_bounds = array<i64: 2>, scalar_prefetch = 0 : i64, scratch_operands = 0 : i64, tpu.core_type = #tpu.core_type<tc>, window_params = [{transform_indices = @transform_0, window_bounds = array<i64: 1, 4, 256>}, {pipeline_mode = #tpu.pipeline_mode<synchronous>, transform_indices = @transform_1, window_bounds = array<i64: 1, 4, 1>}, {pipeline_mode = #tpu.pipeline_mode<synchronous>, transform_indices = @transform_2, window_bounds = array<i64: 1, 4, 1>}, {pipeline_mode = #tpu.pipeline_mode<synchronous>, transform_indices = @transform_3, window_bounds = array<i64: 1, 4, 1>}, {transform_indices = @transform_4, window_bounds = array<i64: 1, 4, 256>}]} {
    %c0 = arith.constant 0 : index
    %c0_0 = arith.constant 0 : index
    %c0_1 = arith.constant 0 : index
    %0 = vector.load %arg1[%c0, %c0_0, %c0_1] : memref<1x4x256xf32, #tpu.memory_space<vmem>>, vector<1x4x256xf32>
    %cst = arith.constant dense<0.000000e+00> : vector<1x4xf32>
    %1 = vector.multi_reduction <add>, %0, %cst [2] : vector<1x4x256xf32> to vector<1x4xf32>
    %2 = vector.shape_cast %1 : vector<1x4xf32> to vector<1x4x1xf32>
    %cst_2 = arith.constant 2.560000e+02 : f32
    %3 = vector.broadcast %cst_2 : f32 to vector<1x4x1xf32>
    %4 = arith.divf %2, %3 : vector<1x4x1xf32>
    %5 = vector.broadcast %4 : vector<1x4x1xf32> to vector<1x4x256xf32>
    %6 = arith.subf %0, %5 : vector<1x4x256xf32>
    %7 = arith.mulf %6, %6 : vector<1x4x256xf32>
    %cst_3 = arith.constant dense<0.000000e+00> : vector<1x4xf32>
    %8 = vector.multi_reduction <add>, %7, %cst_3 [2] : vector<1x4x256xf32> to vector<1x4xf32>
    %9 = vector.shape_cast %8 : vector<1x4xf32> to vector<1x4x1xf32>
    %cst_4 = arith.constant 2.550000e+02 : f32
    %10 = vector.broadcast %cst_4 : f32 to vector<1x4x1xf32>
    %11 = arith.divf %9, %10 : vector<1x4x1xf32>
    %cst_5 = arith.constant 9.99999974E-6 : f32
    %12 = vector.broadcast %cst_5 : f32 to vector<1x4x1xf32>
    %13 = arith.addf %11, %12 : vector<1x4x1xf32>
    %14 = math.rsqrt %13 : vector<1x4x1xf32>
    %cst_6 = arith.constant dense<0.000000e+00> : vector<1x1xf32>
    %15 = vector.multi_reduction <add>, %4, %cst_6 [1] : vector<1x4x1xf32> to vector<1x1xf32>
    %16 = vector.shape_cast %15 : vector<1x1xf32> to vector<1x1x1xf32>
    %cst_7 = arith.constant 4.000000e+00 : f32
    %17 = vector.broadcast %cst_7 : f32 to vector<1x1x1xf32>
    %18 = arith.divf %16, %17 : vector<1x1x1xf32>
    %19 = vector.broadcast %18 : vector<1x1x1xf32> to vector<1x4x1xf32>
    %20 = arith.subf %4, %19 : vector<1x4x1xf32>
    %cst_8 = arith.constant dense<0.000000e+00> : vector<1x1xf32>
    %21 = vector.multi_reduction <add>, %9, %cst_8 [1] : vector<1x4x1xf32> to vector<1x1xf32>
    %22 = vector.shape_cast %21 : vector<1x1xf32> to vector<1x1x1xf32>
    %23 = arith.mulf %20, %20 : vector<1x4x1xf32>
    %cst_9 = arith.constant dense<0.000000e+00> : vector<1x1xf32>
    %24 = vector.multi_reduction <add>, %23, %cst_9 [1] : vector<1x4x1xf32> to vector<1x1xf32>
    %25 = vector.shape_cast %24 : vector<1x1xf32> to vector<1x1x1xf32>
    %cst_10 = arith.constant 2.560000e+02 : f32
    %26 = vector.broadcast %cst_10 : f32 to vector<1x1x1xf32>
    %27 = arith.mulf %26, %25 : vector<1x1x1xf32>
    %28 = arith.addf %22, %27 : vector<1x1x1xf32>
    %cst_11 = arith.constant 1.023000e+03 : f32
    %29 = vector.broadcast %cst_11 : f32 to vector<1x1x1xf32>
    %30 = arith.divf %28, %29 : vector<1x1x1xf32>
    %cst_12 = arith.constant 9.99999974E-6 : f32
    %31 = vector.broadcast %cst_12 : f32 to vector<1x1x1xf32>
    %32 = arith.addf %30, %31 : vector<1x1x1xf32>
    %33 = math.rsqrt %32 : vector<1x1x1xf32>
    %c0_13 = arith.constant 0 : index
    %c0_14 = arith.constant 0 : index
    %c0_15 = arith.constant 0 : index
    %34 = vector.load %arg2[%c0_13, %c0_14, %c0_15] : memref<1x4x1xf32, #tpu.memory_space<vmem>>, vector<1x4x1xf32>
    %c0_16 = arith.constant 0 : index
    %c0_17 = arith.constant 0 : index
    %c0_18 = arith.constant 0 : index
    %35 = vector.load %arg3[%c0_16, %c0_17, %c0_18] : memref<1x4x1xf32, #tpu.memory_space<vmem>>, vector<1x4x1xf32>
    %c0_19 = arith.constant 0 : index
    %c0_20 = arith.constant 0 : index
    %c0_21 = arith.constant 0 : index
    %36 = vector.load %arg4[%c0_19, %c0_20, %c0_21] : memref<1x4x1xf32, #tpu.memory_space<vmem>>, vector<1x4x1xf32>
    %37 = arith.mulf %34, %14 : vector<1x4x1xf32>
    %cst_22 = arith.constant 1.000000e+00 : f32
    %38 = vector.broadcast %cst_22 : f32 to vector<1x4x1xf32>
    %39 = arith.subf %38, %34 : vector<1x4x1xf32>
    %40 = vector.broadcast %33 : vector<1x1x1xf32> to vector<1x4x1xf32>
    %41 = arith.mulf %39, %40 : vector<1x4x1xf32>
    %42 = arith.addf %37, %41 : vector<1x4x1xf32>
    %43 = arith.mulf %35, %42 : vector<1x4x1xf32>
    %44 = arith.mulf %34, %4 : vector<1x4x1xf32>
    %45 = arith.mulf %44, %14 : vector<1x4x1xf32>
    %cst_23 = arith.constant 1.000000e+00 : f32
    %46 = vector.broadcast %cst_23 : f32 to vector<1x4x1xf32>
    %47 = arith.subf %46, %34 : vector<1x4x1xf32>
    %48 = vector.broadcast %18 : vector<1x1x1xf32> to vector<1x4x1xf32>
    %49 = arith.mulf %47, %48 : vector<1x4x1xf32>
    %50 = vector.broadcast %33 : vector<1x1x1xf32> to vector<1x4x1xf32>
    %51 = arith.mulf %49, %50 : vector<1x4x1xf32>
    %52 = arith.addf %45, %51 : vector<1x4x1xf32>
    %53 = arith.mulf %35, %52 : vector<1x4x1xf32>
    %54 = arith.subf %36, %53 : vector<1x4x1xf32>
    %55 = vector.broadcast %43 : vector<1x4x1xf32> to vector<1x4x256xf32>
    %56 = arith.mulf %0, %55 : vector<1x4x256xf32>
    %57 = vector.broadcast %54 : vector<1x4x1xf32> to vector<1x4x256xf32>
    %58 = arith.addf %56, %57 : vector<1x4x256xf32>
    %c0_24 = arith.constant 0 : index
    %c0_25 = arith.constant 0 : index
    %c0_26 = arith.constant 0 : index
    %59 = vector.load %arg5[%c0_24, %c0_25, %c0_26] : memref<1x4x256xf32, #tpu.memory_space<vmem>>, vector<1x4x256xf32>
    tpu.vector_store %arg5[%c0_24, %c0_25, %c0_26], %58 {strides = array<i32>} : memref<1x4x256xf32, #tpu.memory_space<vmem>>, vector<1x4x256xf32>,
    return
  }
  func.func @transform_0(%arg0: i32) -> (i32, i32, i32) {
    %c0_i32 = arith.constant 0 : i32
    %c0_i32_0 = arith.constant 0 : i32
    %c0_i32_1 = arith.constant 0 : i32
    return %arg0, %c0_i32, %c0_i32_0 : i32, i32, i32
  }
  func.func @transform_1(%arg0: i32) -> (i32, i32, i32) {
    %c0_i32 = arith.constant 0 : i32
    %c0_i32_0 = arith.constant 0 : i32
    %c0_i32_1 = arith.constant 0 : i32
    %c0_i32_2 = arith.constant 0 : i32
    return %c0_i32, %c0_i32_0, %c0_i32_1 : i32, i32, i32
  }
  func.func @transform_2(%arg0: i32) -> (i32, i32, i32) {
    %c0_i32 = arith.constant 0 : i32
    %c0_i32_0 = arith.constant 0 : i32
    %c0_i32_1 = arith.constant 0 : i32
    %c0_i32_2 = arith.constant 0 : i32
    return %c0_i32, %c0_i32_0, %c0_i32_1 : i32, i32, i32
  }
  func.func @transform_3(%arg0: i32) -> (i32, i32, i32) {
    %c0_i32 = arith.constant 0 : i32
    %c0_i32_0 = arith.constant 0 : i32
    %c0_i32_1 = arith.constant 0 : i32
    %c0_i32_2 = arith.constant 0 : i32
    return %c0_i32, %c0_i32_0, %c0_i32_1 : i32, i32, i32
  }
  func.func @transform_4(%arg0: i32) -> (i32, i32, i32) {
    %c0_i32 = arith.constant 0 : i32
    %c0_i32_0 = arith.constant 0 : i32
    %c0_i32_1 = arith.constant 0 : i32
    return %arg0, %c0_i32, %c0_i32_0 : i32, i32, i32
  }
}

</mosaic_0001>

<bundles_post_ra>
// kernel: tpu_custom_call.1
= control target key start
LH: loop header
LB: loop body
LE: loop exit
PB: predicated region body
PF: predicated region fallthrough
CT: control target
= control target key end

     0   :  { %9 = vsyncpa [#allocation3], 0  ;;  %s798_s0 = inlined_call_operand.hbm [shape: f32[2,4,256], index: 0, kind: input, shape index: {}]   ;;  %s799_s1 = inlined_call_operand.vmem [shape: f32[1,4,1], index: 1, kind: input, shape index: {}]   ;;  %s800_s2 = inlined_call_operand.vmem [shape: f32[1,4,1], index: 2, kind: input, shape index: {}]   ;;  %s801_s3 = inlined_call_operand.vmem [shape: f32[1,4,1], index: 3, kind: input, shape index: {}]   ;;  %s802_s4 = inlined_call_operand.hbm [shape: f32[2,4,256], index: 4, kind: output, shape index: {}]  }
   0x1   :  { %11 = vsyncpa [#allocation3 + $0x1], 0 }
   0x2   :  { %12 = vsyncpa [#allocation4], 0 }
   0x3   :  { %14 = vsyncpa [#allocation4 + $0x1], 0  ;;  %s605_s15 = smov 0   ;;  %s607_s16 = smov 0  }
   0x4   :  { %s609_s17 = smov 0   ;;  %s611_s18 = smov 0  }
   0x5 LB: > { %s626_s19 = sadd.s32 4294967295, %s574_s18   ;;  %s407_s20 = sadd.s32 4294967294, %s574_s18   ;;  %s574_s18 = sphi %s611_s18, %s817_s18   ;;  %s570_s17 = sphi %s609_s17, %s816_s17   ;;  %s566_s16 = sphi %s607_s16, %s815_s16   ;;  %s562_s15 = sphi %s605_s15, %s814_s15  }
   0x6   : > { %s630_s21 = sadd.s32 1, %s574_s18   ;;  %s27_s22 = sadd.s32 1, %s570_s17 }
   0x7   : > { %s24_s23 = ssub.s32 %s574_s18, %s630_s21  ;;  %p34_p0 = scmp.ne.s32.totalorder %s570_s17, %s566_s16 }
   0x8   : > { %p25_p1 = scmp.eq.s32.totalorder %s24_s23, 0  ;;  %p35_p2 = scmp.eq.s32.totalorder %s574_s18, 0 }
   0x9   : > { %p40_p3 = scmp.ne.s32.totalorder %s566_s16, %s562_s15  ;;  %p41_p4 = scmp.eq.s32.totalorder %s626_s19, 0 }
   0xa   : > { %s642_s24 = scalar_select %p25_p1, %s570_s17, %s27_s22  }
   0xb   : > { %p644_p5 = por %p35_p2, %p34_p0  ;;  %p648_p6 = por %p41_p4, %p40_p3 }
   0xc   : > { %p127_p7 = scmp.eq.s32.totalorder %s626_s19, 1  ;;  %p133_p8 = scmp.eq.s32.totalorder %s407_s20, 1 }
   0xd   : > { %p435_p10 = scmp.lt.s32.totalorder %s574_s18, 2  ;;  %s162_s29 = sand.u32 1, %s570_s17  }
   0xe   : > { %p655_p11 = por %p127_p7, %p34_p0  ;;  %p659_p12 = por %p133_p8, %p40_p3 }
   0xf   : > { %s421_s30 = sshll.u32 %s574_s18, 7  ;;  %s410_s5 = sshll.u32 %s162_s29, 3 }
  0x10   : > { %s806_s27 = scalar_select %p655_p11, 1, 0 }
  0x11   : > { %s807_s28 = scalar_select %p659_p12, 1, 0 }
  0x12   : > { %s668_s8 = scalar_lea.hbm %s798_s0, %s421_s30  ;;  %s166_s9 = scalar_lea.vmem [#allocation2], %s410_s5 }
  0x13   : > { %s174_s10 = sshll.u32 %s166_s9, 4  ;;  %p672_p13 = pnand %p435_p10, %p644_p5  ;;  %s676_s10 = int_to_ptr.vmem [resolvable:$true] %s174_s10 }
  0x14   : > { %s163_s12 = scalar_lea.sflag [#allocation3], %s162_s29  ;;  %s478_s13 = scalar_lea.hbm %s668_s8, 128 }
  0x15   : > { %p479_p2 = scmp.ne.s32.totalorder %s668_s8, %s478_s13  ;;  %p480_p3 = pneg %p672_p13 }
  0x16   : > { %s483_s22 = scalar_lea.hbm %s798_s0, 256  ;;  %p484_p5 = scmp.lt.u32.totalorder %s668_s8, %s798_s0 }
  0x17   : > { %p481_p4 = pnand %p480_p3, %p479_p2  ;;  %p485_p8 = scmp.lt.u32.totalorder %s483_s22, %s478_s13 }
  0x18   : > { %p487_p9 = scmp.lt.u32.totalorder %s478_s13, %s668_s8 }
  0x19   : > { %p482_p7 = pneg %p481_p4  ;;  %p486_p10 = por %p485_p8, %p484_p5 }
  0x1b   : > { %p488_p0 = por %p487_p9, %p486_p10 }
  0x1d   : > { %p489_p1 = pnand %p488_p0, %p482_p7 }
  0x1f   : > { %492 = shalt.err (!%p489_p1)
}
  0x20   : > { %s493_s29 = scalar_lea.vmem %s676_s10, 128  ;;  %s576_s30 = smov [#allocation2]  }
  0x21   : > { %p494_p2 = scmp.ne.s32.totalorder %s676_s10, %s493_s29  ;;  %s498_s5 = sshll.u32 %s576_s30, 4  ;;  %s499_s5 = int_to_ptr.vmem [resolvable:$false] %s498_s5 }
  0x22   : > { %s500_s6 = scalar_lea.vmem %s499_s5, 256  ;;  %p501_p11 = scmp.lt.s32.totalorder %s676_s10, %s499_s5 }
  0x23   : > { %p496_p4 = pnand %p494_p2, %p480_p3  ;;  %p502_p5 = scmp.lt.s32.totalorder %s500_s6, %s493_s29 }
  0x25   : > { %p497_p12 = pneg %p496_p4  ;;  %p503_p8 = por %p502_p5, %p501_p11 }
  0x27   : > { %p504_p9 = pnand %p503_p8, %p497_p12 }
  0x29   : > { %507 = shalt.err (!%p504_p9)
}
  0x2a   : > { %430 = dma.hbm_to_vmem [thread:$0]  (!%p672_p13), %s668_s8, 128, %s676_s10, %s163_s12  }
  0x2b   : > { %p809_p0 = scmp.lt.s32.totalorder %s574_s18, 3  ;;  %p810_p1 = scmp.ge.s32.totalorder %s574_s18, 1 }
  0x2d   : > { %p180_p3 = pnand %p810_p1, %p809_p0 }
  0x2e   : > { %s710_s7 = sand.u32 (!%p180_p3), 1, %s566_s16  }
  0x2f   : > { %183 = sbr.rel (%p180_p3) target bundleno = 544 (0x220), region = 36  ;;  %s414_s9 = sshll.u32 (!%p180_p3), %s710_s7, 3 }
  0x30   : > { %s186_s13 = scalar_lea.sflag (!%p180_p3), [#allocation3], %s710_s7  ;;  %s189_s11 = scalar_lea.vmem (!%p180_p3), [#allocation2], %s414_s9 }
  0x36   : > { %553 = dma.done.wait (%p648_p6), %s186_s13, 128  }
  0x37   : > { %555 = vsyncadd (%p648_p6), %s186_s13, 4294967168  ;;  %vm218_vm0 = vcmask 1043456   ;;  %v720_v0 = vld [vmem:[%s189_s11] sm:$0xff]  ;;  %v577_v5 = vmov 839922192   ;;  %v230_v7 = vlaneseq  ;;  %v578_v20 = vmov 0  }
  0x38   : > { %v216_v1 = vcombine.high %v720_v0, %v720_v0  ;;  %v219_v2 = vsel %vm218_vm0, %v720_v0, 0.0  ;;  %v228_v6 = vunpack.c.l.s4 %v577_v5  ;;  %471 = vset.pattern.permute.xlu1 %v578_v20  ;;  %472 = vset.pattern.permute.xlu0 %v578_v20  ;;  %v280_v52 = vld [vmem:[%s799_s1] sm:$0xf]  ;;  %s422_s22 = sshll.u32 %s626_s19, 7  ;;  %s213_s23 = scalar_lea.vmem [#allocation5], %s414_s9 }
  0x39   : > { %v231_v9 = vshrl.u32 %v230_v7, 7  ;;  %v284_v53 = vsub.f32 1.0, %v280_v52  ;;  %v281_v62 = vld [vmem:[%s800_s2] sm:$0xf]  ;;  %s337_s25 = sshll.u32 %s213_s23, 4  ;;  %s754_s5 = scalar_lea.hbm %s802_s4, %s422_s22  ;;  %s756_s25 = int_to_ptr.vmem [resolvable:$true] %s337_s25 }
  0x3a   : > { %v220_v3 = vsel %vm218_vm0, %v216_v1, 0.0  ;;  %v229_v8 = vunpack.c.0.s8 %v228_v6  ;;  %s323_s19 = scalar_lea.sflag [#allocation4], %s710_s7  ;;  %s508_s6 = scalar_lea.vmem %s756_s25, 128 }
  0x3b   : > { %v221_v4 = vadd.f32 %v220_v3, %v219_v2  ;;  %p509_p6 = scmp.ne.s32.totalorder %s756_s25, %s508_s6  ;;  %p811_p11 = scmp.ne.s32.totalorder %s806_s27, 0 }
  0x3c   : > { %v727_v10 = vsub.s32 %v229_v8, %v231_v9  ;;  %s579_s9 = smov [#allocation5]  }
  0x3d   : > { %222 = vadd.xlane.f32.xlu0 %v221_v4  ;;  %v282_v4 = vld [vmem:[%s801_s3] sm:$0xf]  ;;  %p510_p12 = pnand %p509_p6, %p811_p11  ;;  %s512_s13 = sshll.u32 %s579_s9, 4  ;;  %s513_s13 = int_to_ptr.vmem [resolvable:$false] %s512_s13 }
  0x3e   : > { %s514_s11 = scalar_lea.vmem %s513_s13, 256  ;;  %p515_p7 = scmp.lt.s32.totalorder %s756_s25, %s513_s13 }
  0x3f   : > { %p511_p13 = pneg %p510_p12  ;;  %p516_p10 = scmp.lt.s32.totalorder %s514_s11, %s508_s6 }
  0x41   : > { %p517_p2 = por %p516_p10, %p515_p7 }
  0x43   : > { %p518_p4 = pnand %p517_p2, %p511_p13 }
  0xca   : > { %v223_v11 = vpop.xlane.xlu0 %222 }
  0xcb   : > { %v225_v12 = vmul.f32 0.00390625, %v223_v11 }
  0xcd   : > { %v233_v13 = vrot.slane %v225_v12, %v727_v10  ;;  %v249_v21 = vsel %vm218_vm0, %v225_v12, 0.0  ;;  %v288_v55 = vmul.f32 %v280_v52, %v225_v12 }
  0xce   : > { %v250_v22 = vrot.slane %v249_v21, 4 }
  0xcf   : > { %v235_v14 = vsub.f32 %v720_v0, %v233_v13 }
  0xd0   : > { %v251_v23 = vadd.f32 %v250_v22, %v249_v21 }
  0xd1   : > { %v236_v15 = vmul.f32 %v235_v14, %v235_v14 }
  0xd2   : > { %v252_v24 = vrot.slane %v251_v23, 2 }
  0xd3   : > { %v238_v16 = vcombine.high %v236_v15, %v236_v15  ;;  %v240_v17 = vsel %vm218_vm0, %v236_v15, 0.0 }
  0xd4   : > { %v253_v25 = vadd.f32 %v252_v24, %v251_v23 }
  0xd5   : > { %v241_v18 = vsel %vm218_vm0, %v238_v16, 0.0 }
  0xd6   : > { %v242_v19 = vadd.f32 %v241_v18, %v240_v17  ;;  %v254_v26 = vrot.slane %v253_v25, 1 }
  0xd8   : > { %243 = vadd.xlane.f32.xlu0 %v242_v19  ;;  %v255_v27 = vadd.f32 %v254_v26, %v253_v25 }
  0xda   : > { %v257_v28 = vmul.f32 0.25, %v255_v27 }
  0xdc   : > { %v258_v29 = vsub.f32 %v225_v12, %v257_v28  ;;  %v290_v56 = vmul.f32 %v284_v53, %v257_v28 }
  0xde   : > { %v266_v30 = vmul.f32 %v258_v29, %v258_v29 }
  0xe0   : > { %v267_v31 = vsel %vm218_vm0, %v266_v30, 0.0 }
  0xe1   : > { %v268_v32 = vrot.slane %v267_v31, 4 }
  0xe3   : > { %v269_v33 = vadd.f32 %v268_v32, %v267_v31 }
  0xe5   : > { %v270_v34 = vrot.slane %v269_v33, 2 }
  0xe7   : > { %v271_v35 = vadd.f32 %v270_v34, %v269_v33 }
  0xe9   : > { %v272_v39 = vrot.slane %v271_v35, 1 }
  0xeb   : > { %v273_v42 = vadd.f32 %v272_v39, %v271_v35 }
  0xed   : > { %v274_v46 = vmul.f32 256.0, %v273_v42 }
 0x165   : > { %v244_v36 = vpop.xlane.xlu0 %243 }
 0x166   : > { %v259_v37 = vsel %vm218_vm0, %v244_v36, 0.0  ;;  %v246_v44 = vmul.f32 0.003921569, %v244_v36 }
 0x167   : > { %v260_v38 = vrot.slane %v259_v37, 4 }
 0x168   : > { %v247_v48 = vadd.f32 1e-05, %v246_v44 }
 0x169   : > { %v261_v40 = vadd.f32 %v260_v38, %v259_v37 }
 0x16a   : > { %474 = vrsqrt.f32 %v247_v48 }
 0x16b   : > { %v262_v41 = vrot.slane %v261_v40, 2 }
 0x16d   : > { %v263_v43 = vadd.f32 %v262_v41, %v261_v40 }
 0x16f   : > { %v264_v45 = vrot.slane %v263_v43, 1 }
 0x171   : > { %v265_v47 = vadd.f32 %v264_v45, %v263_v43 }
 0x173   : > { %v275_v49 = vadd.f32 %v274_v46, %v265_v47 }
 0x174   : > { %v475_v54 = vpop.eup %474 }
 0x175   : > { %v277_v50 = vmul.f32 0.0009775171, %v275_v49  ;;  %v283_v58 = vmul.f32 %v475_v54, %v280_v52  ;;  %v289_v60 = vmul.f32 %v475_v54, %v288_v55 }
 0x177   : > { %v278_v51 = vadd.f32 1e-05, %v277_v50 }
 0x179   : > { %476 = vrsqrt.f32 %v278_v51 }
 0x183   : > { %v477_v57 = vpop.eup %476 }
 0x184   : > { %v285_v59 = vmul.f32 %v477_v57, %v284_v53  ;;  %v291_v61 = vmul.f32 %v477_v57, %v290_v56 }
 0x186   : > { %v286_v63 = vadd.f32 %v285_v59, %v283_v58  ;;  %v292_v1 = vadd.f32 %v291_v61, %v289_v60 }
 0x188   : > { %v287_v2 = vmul.f32 %v286_v63, %v281_v62  ;;  %v293_v3 = vmul.f32 %v292_v1, %v281_v62 }
 0x18a   : > { %297 = vperm.xlu1 %471, %v287_v2   ;;  %v294_v5 = vsub.f32 %v282_v4, %v293_v3 }
 0x18e   : > { %310 = vperm.xlu1 %471, %v294_v5  }
 0x209   : > { %v298_v6 = vpop.permute.xlu1 %297 }
 0x20a   : > { %v305_v7 = vrot.slane %v298_v6, %v727_v10 }
 0x20c   : > { %v307_v9 = vmul.f32 %v305_v7, %v720_v0 }
 0x20d   : > { %v311_v8 = vpop.permute.xlu1 %310 }
 0x20e   : > { %v318_v11 = vrot.slane %v311_v8, %v727_v10 }
 0x210   : > { %v320_v12 = vadd.f32 %v318_v11, %v307_v9 }
 0x212   : > { %321 = vst [vmem:[%s213_s23] sm:$0xff] %v320_v12 }
 0x213   : > { %521 = shalt.err (!%p518_p4)
}
 0x214   : > { %s522_s7 = scalar_lea.hbm %s754_s5, 128  ;;  %s526_s10 = scalar_lea.hbm %s802_s4, 256 }
 0x215   : > { %p523_p5 = scmp.ne.s32.totalorder %s754_s5, %s522_s7  ;;  %p527_p0 = scmp.lt.u32.totalorder %s754_s5, %s802_s4 }
 0x216   : > { %p528_p1 = scmp.lt.u32.totalorder %s526_s10, %s522_s7  ;;  %p530_p6 = scmp.lt.u32.totalorder %s522_s7, %s754_s5 }
 0x217   : > { %p524_p8 = pnand %p523_p5, %p811_p11 }
 0x218   : > { %p529_p3 = por %p528_p1, %p527_p0 }
 0x219   : > { %p525_p9 = pneg %p524_p8 }
 0x21a   : > { %p531_p12 = por %p530_p6, %p529_p3 }
 0x21c   : > { %p532_p13 = pnand %p531_p12, %p525_p9 }
 0x21e   : > { %535 = shalt.err (!%p532_p13)
}
 0x21f   : > { %425 = dma.vmem_to_hbm [thread:$0]  (%p811_p11), %s756_s25, 128, %s754_s5, %s323_s19  }
 0x220 PF: > { %s349_s20 = sand.u32 1, %s562_s15   ;;  %p812_p7 = scmp.ne.s32.totalorder %s807_s28, 0 }
 0x221   : > { %p813_p10 = scmp.ge.s32.totalorder %s574_s18, 2  ;;  %s350_s22 = scalar_lea.sflag [#allocation4], %s349_s20 }
 0x223   : > { %p432_p2 = pnand %p813_p10, %p812_p7 }
 0x225   : > { %557 = dma.done.wait (!%p432_p2), %s350_s22, 128  }
 0x226   : > { %559 = vsyncadd (!%p432_p2), %s350_s22, 4294967168  ;;  %p17_p4 = scmp.ge.s32.totalorder %s630_s21, 4   ;;  %s814_s15 = smov %s566_s16 }
 0x227   : > { %s815_s16 = smov %s570_s17  ;;  %s816_s17 = smov %s642_s24 }
 0x228   : > { %s817_s18 = smov %s630_s21  ;;  %19 = sbr.rel (!%p17_p4) target bundleno = 5 (0x5), region = 81 }
 0x22f   :  { %355 = vsyncpa [#allocation3], 1 }
 0x230   :  { %357 = vsyncpa [#allocation3 + $0x1], 1 }
 0x231   :  { %358 = vsyncpa [#allocation4], 1 }
 0x232   :  { %360 = vsyncpa [#allocation4 + $0x1], 1 }

</bundles_post_ra>
